<compile_context>
chip_gen: v7x
topology: tpu7x:2x2x1
jax: 0.10.0
libtpu: 0.0.40
codegen_flags: <defaults>
</compile_context>

<pallas_src>
import jax
import jax.numpy as jnp
from jax.experimental import pallas as pl
from jax.experimental.pallas import tpu as pltpu


def _pointer_gen_kernel(dh_ref, cv_ref, w_dh_ref, w_cv_ref, b_ref, out_ref):
    # dh_ref/cv_ref: (TM, H)   w_dh_ref/w_cv_ref: (1, H)
    # b_ref: (1, 1) in SMEM    out_ref: (TM, 1)
    dh = dh_ref[...].astype(jnp.float32)
    cv = cv_ref[...].astype(jnp.float32)
    w_dh = w_dh_ref[...].astype(jnp.float32)          # broadcasts over rows
    w_cv = w_cv_ref[...].astype(jnp.float32)
    logits = (jnp.sum(dh * w_dh, axis=-1, keepdims=True)
              + jnp.sum(cv * w_cv, axis=-1, keepdims=True)
              + b_ref[0, 0])                           # scalar bias from SMEM
    out_ref[...] = jax.nn.sigmoid(logits).astype(out_ref.dtype)


def _pick_tile_m(M, H, itemsize):
    """Row-tile size: multiple of 8, sized so 2 inputs x 2 pipeline buffers
    stay well inside the smallest (v5e, 16 MiB) scoped-VMEM default."""
    budget = 8 * 1024 * 1024                     # bytes for dh+cv double buffers
    tm = budget // max(1, 2 * 2 * H * itemsize)
    tm = max(8, min(2048, (tm // 8) * 8))
    m_pad = ((M + 7) // 8) * 8
    return min(tm, m_pad)


def pointer_generator(decoder_hidden, context_vector, weight, bias):
    """decoder_hidden, context_vector: (B, S, H) float32 or bfloat16
       weight: (1, 2H) (PyTorch nn.Linear layout), bias: (1,)
       returns p_gen: (B, S, 1) float32"""
    B, S, H = decoder_hidden.shape
    M = B * S
    dh = decoder_hidden.reshape(M, H)
    cv = context_vector.reshape(M, H)

    # Split the (1, 2H) Linear weight into two lane-dense (1, H) rows:
    # columns [:H] multiply decoder_hidden, [H:] multiply context_vector
    # (preserves the concat ordering of the PyTorch module).
    w_dh = weight[:, :H].astype(jnp.float32)
    w_cv = weight[:, H:].astype(jnp.float32)
    b = bias.reshape(1, 1).astype(jnp.float32)

    tm = _pick_tile_m(M, H, dh.dtype.itemsize)
    grid = (pl.cdiv(M, tm),)

    in_bytes = dh.size * dh.dtype.itemsize + cv.size * cv.dtype.itemsize
    cost = pl.CostEstimate(
        flops=4 * M * H + 4 * M,
        transcendentals=M,                       # sigmoid -> exp per row
        bytes_accessed=in_bytes + M * 4 + 2 * H * 4 + 4,
    )

    out = pl.pallas_call(
        _pointer_gen_kernel,
        out_shape=jax.ShapeDtypeStruct((M, 1), jnp.float32),
        grid_spec=pltpu.PrefetchScalarGridSpec(
            num_scalar_prefetch=0,
            grid=grid,
            in_specs=[
                pl.BlockSpec((tm, H), lambda i: (i, 0)),      # decoder_hidden
                pl.BlockSpec((tm, H), lambda i: (i, 0)),      # context_vector
                pl.BlockSpec((1, H), lambda i: (0, 0)),       # w_dh (resident)
                pl.BlockSpec((1, H), lambda i: (0, 0)),       # w_cv (resident)
                pl.BlockSpec(memory_space=pltpu.MemorySpace.SMEM),  # bias
            ],
            out_specs=pl.BlockSpec((tm, 1), lambda i: (i, 0)),
        ),
        compiler_params=pltpu.CompilerParams(
            dimension_semantics=("parallel",)),   # megacore sharding on v7x
        cost_estimate=cost,
    )(dh, cv, w_dh, w_cv, b)

    return out.reshape(B, S, 1)


if __name__ == "__main__":
    B, S, H = 2, 8, 32

    key = jax.random.PRNGKey(0)
    k_dh, k_cv, k_w, k_b = jax.random.split(key, 4)

    decoder_hidden = jax.random.normal(k_dh, (B, S, H), dtype=jnp.float32)
    context_vector = jax.random.normal(k_cv, (B, S, H), dtype=jnp.float32)

    # Deterministic "nn.Linear(hidden_dim * 2, 1)" parameters.
    bound = 1.0 / jnp.sqrt(2.0 * H)
    weight = jax.random.uniform(k_w, (1, 2 * H), minval=-bound, maxval=bound,
                                dtype=jnp.float32)
    bias = jax.random.uniform(k_b, (1,), minval=-bound, maxval=bound,
                              dtype=jnp.float32)

    p_gen = pointer_generator(decoder_hidden, context_vector, weight, bias)
    p_gen = jax.block_until_ready(p_gen)

    # Pure-JAX reference check.
    concat = jnp.concatenate([decoder_hidden, context_vector], axis=-1)
    ref = jax.nn.sigmoid(concat @ weight.T + bias)
    assert p_gen.shape == (B, S, 1)
    assert jnp.allclose(p_gen, ref, atol=1e-5, rtol=1e-5)

    print("KERNEL_OK")
</pallas_src>

<mosaic_0001>
module attributes {stable_mosaic.version = 11 : i64} {
  func.func @_pointer_gen_kernel(%arg0: i32, %arg1: memref<16x32xf32, #tpu.memory_space<vmem>>, %arg2: memref<16x32xf32, #tpu.memory_space<vmem>>, %arg3: memref<1x32xf32, #tpu.memory_space<vmem>>, %arg4: memref<1x32xf32, #tpu.memory_space<vmem>>, %arg5: memref<1x1xf32, #tpu.memory_space<smem>>, %arg6: memref<16x1xf32, #tpu.memory_space<vmem>>) attributes {dimension_semantics = [#tpu.dimension_semantics<parallel>], iteration_bounds = array<i64: 1>, scalar_prefetch = 0 : i64, scratch_operands = 0 : i64, tpu.core_type = #tpu.core_type<tc>, window_params = [{transform_indices = @transform_0, window_bounds = array<i64: 16, 32>}, {transform_indices = @transform_1, window_bounds = array<i64: 16, 32>}, {pipeline_mode = #tpu.pipeline_mode<synchronous>, transform_indices = @transform_2, window_bounds = array<i64: 1, 32>}, {pipeline_mode = #tpu.pipeline_mode<synchronous>, transform_indices = @transform_3, window_bounds = array<i64: 1, 32>}, {transform_indices = @transform_4, window_bounds = array<i64: 1, 1>}, {transform_indices = @transform_5, window_bounds = array<i64: 16, 1>}]} {
    %c0 = arith.constant 0 : index
    %c0_0 = arith.constant 0 : index
    %0 = vector.load %arg1[%c0, %c0_0] : memref<16x32xf32, #tpu.memory_space<vmem>>, vector<16x32xf32>
    %c0_1 = arith.constant 0 : index
    %c0_2 = arith.constant 0 : index
    %1 = vector.load %arg2[%c0_1, %c0_2] : memref<16x32xf32, #tpu.memory_space<vmem>>, vector<16x32xf32>
    %c0_3 = arith.constant 0 : index
    %c0_4 = arith.constant 0 : index
    %2 = vector.load %arg3[%c0_3, %c0_4] : memref<1x32xf32, #tpu.memory_space<vmem>>, vector<1x32xf32>
    %c0_5 = arith.constant 0 : index
    %c0_6 = arith.constant 0 : index
    %3 = vector.load %arg4[%c0_5, %c0_6] : memref<1x32xf32, #tpu.memory_space<vmem>>, vector<1x32xf32>
    %4 = vector.broadcast %2 : vector<1x32xf32> to vector<16x32xf32>
    %5 = arith.mulf %0, %4 : vector<16x32xf32>
    %cst = arith.constant dense<0.000000e+00> : vector<16xf32>
    %6 = vector.multi_reduction <add>, %5, %cst [1] : vector<16x32xf32> to vector<16xf32>
    %7 = vector.shape_cast %6 : vector<16xf32> to vector<16x1xf32>
    %8 = vector.broadcast %3 : vector<1x32xf32> to vector<16x32xf32>
    %9 = arith.mulf %1, %8 : vector<16x32xf32>
    %cst_7 = arith.constant dense<0.000000e+00> : vector<16xf32>
    %10 = vector.multi_reduction <add>, %9, %cst_7 [1] : vector<16x32xf32> to vector<16xf32>
    %11 = vector.shape_cast %10 : vector<16xf32> to vector<16x1xf32>
    %12 = arith.addf %7, %11 : vector<16x1xf32>
    %c0_8 = arith.constant 0 : index
    %c0_9 = arith.constant 0 : index
    %13 = memref.load %arg5[%c0_8, %c0_9] : memref<1x1xf32, #tpu.memory_space<smem>>
    %14 = vector.broadcast %13 : f32 to vector<16x1xf32>
    %15 = arith.addf %12, %14 : vector<16x1xf32>
    %16 = arith.negf %15 : vector<16x1xf32>
    %17 = math.exp %16 : vector<16x1xf32>
    %cst_10 = arith.constant 1.000000e+00 : f32
    %18 = vector.broadcast %cst_10 : f32 to vector<16x1xf32>
    %19 = arith.addf %18, %17 : vector<16x1xf32>
    %20 = arith.divf %18, %19 : vector<16x1xf32>
    %c0_11 = arith.constant 0 : index
    %c0_12 = arith.constant 0 : index
    %21 = vector.load %arg6[%c0_11, %c0_12] : memref<16x1xf32, #tpu.memory_space<vmem>>, vector<16x1xf32>
    tpu.vector_store %arg6[%c0_11, %c0_12], %20 {strides = array<i32>} : memref<16x1xf32, #tpu.memory_space<vmem>>, vector<16x1xf32>,
    return
  }
  func.func @transform_0(%arg0: i32) -> (i32, i32) {
    %c0_i32 = arith.constant 0 : i32
    %c0_i32_0 = arith.constant 0 : i32
    return %arg0, %c0_i32 : i32, i32
  }
  func.func @transform_1(%arg0: i32) -> (i32, i32) {
    %c0_i32 = arith.constant 0 : i32
    %c0_i32_0 = arith.constant 0 : i32
    return %arg0, %c0_i32 : i32, i32
  }
  func.func @transform_2(%arg0: i32) -> (i32, i32) {
    %c0_i32 = arith.constant 0 : i32
    %c0_i32_0 = arith.constant 0 : i32
    %c0_i32_1 = arith.constant 0 : i32
    return %c0_i32, %c0_i32_0 : i32, i32
  }
  func.func @transform_3(%arg0: i32) -> (i32, i32) {
    %c0_i32 = arith.constant 0 : i32
    %c0_i32_0 = arith.constant 0 : i32
    %c0_i32_1 = arith.constant 0 : i32
    return %c0_i32, %c0_i32_0 : i32, i32
  }
  func.func @transform_4(%arg0: i32) -> (i32, i32) {
    %c0_i32 = arith.constant 0 : i32
    %c0_i32_0 = arith.constant 0 : i32
    %c0_i32_1 = arith.constant 0 : i32
    return %c0_i32, %c0_i32_0 : i32, i32
  }
  func.func @transform_5(%arg0: i32) -> (i32, i32) {
    %c0_i32 = arith.constant 0 : i32
    %c0_i32_0 = arith.constant 0 : i32
    return %arg0, %c0_i32 : i32, i32
  }
}

</mosaic_0001>

<bundles_post_ra>
// kernel: tpu_custom_call.1
= control target key start
LH: loop header
LB: loop body
LE: loop exit
PB: predicated region body
PF: predicated region fallthrough
CT: control target
= control target key end

     0   :  { %11 = vsyncpa [#allocation4], 0  ;;  %s248_s0 = inlined_call_operand.hbm [shape: f32[16,32], index: 0, kind: input, shape index: {}]   ;;  %s249_s1 = inlined_call_operand.hbm [shape: f32[16,32], index: 1, kind: input, shape index: {}]   ;;  %s250_s2 = inlined_call_operand.vmem [shape: f32[1,32], index: 2, kind: input, shape index: {}]   ;;  %s251_s3 = inlined_call_operand.vmem [shape: f32[1,32], index: 3, kind: input, shape index: {}]   ;;  %s252_s4 = inlined_call_operand.<no memory space> [shape: f32[1,1], index: 4, kind: input, shape index: {}]   ;;  %s253_s5 = inlined_call_operand.vmem [shape: f32[16,1], index: 5, kind: output, shape index: {}]  }
   0x1   :  { %12 = vsyncpa [#allocation6], 0  ;;  %s175_s18 = smov [#allocation3]   ;;  %s127_s22 = scalar_lea.hbm %s248_s0, 256 }
   0x2   :  { %s18_s19 = sshll.u32 %s175_s18, 4  ;;  %p128_p0 = scmp.ne.s32.totalorder %s248_s0, %s127_s22  ;;  %s19_s19 = int_to_ptr.vmem [resolvable:$true] %s18_s19 }
   0x3   :  { %p131_p1 = scmp.lt.u32.totalorder %s127_s22, %s248_s0 }
   0x5   :  { %p133_p2 = pnand %p131_p1, %p128_p0 }
   0x7   :  { %136 = shalt.err (!%p133_p2)
}
   0x8   :  { %s137_s27 = scalar_lea.vmem %s19_s19, 256  ;;  %p142_p4 = scmp.lt.s32.totalorder %s19_s19, %s19_s19 }
   0x9   :  { %p138_p3 = scmp.ne.s32.totalorder %s19_s19, %s137_s27  ;;  %p143_p5 = scmp.lt.s32.totalorder %s137_s27, %s137_s27 }
   0xb   :  { %p144_p6 = por %p143_p5, %p142_p4 }
   0xd   :  { %p145_p7 = pnand %p144_p6, %p138_p3 }
   0xf   :  { %148 = shalt.err (!%p145_p7)
}
  0x10   :  { %s176_s28 = smov 128   ;;  %s177_s29 = smov 8  }
  0x11   :  { %24 = dma.hbm_to_vmem [thread:$0]  %s248_s0, 256, %s19_s19, [#allocation4], %s176_s28, %s176_s28, %s177_s29  }
  0x12   :  { %s178_s7 = smov [#allocation5]   ;;  %s149_s11 = scalar_lea.hbm %s249_s1, 256 }
  0x13   :  { %s30_s8 = sshll.u32 %s178_s7, 4  ;;  %p150_p8 = scmp.ne.s32.totalorder %s249_s1, %s149_s11  ;;  %s31_s8 = int_to_ptr.vmem [resolvable:$true] %s30_s8 }
  0x14   :  { %p153_p9 = scmp.lt.u32.totalorder %s149_s11, %s249_s1 }
  0x16   :  { %p155_p10 = pnand %p153_p9, %p150_p8 }
  0x18   :  { %158 = shalt.err (!%p155_p10)
}
  0x19   :  { %s159_s16 = scalar_lea.vmem %s31_s8, 256  ;;  %p164_p12 = scmp.lt.s32.totalorder %s31_s8, %s31_s8 }
  0x1a   :  { %p160_p11 = scmp.ne.s32.totalorder %s31_s8, %s159_s16  ;;  %p165_p13 = scmp.lt.s32.totalorder %s159_s16, %s159_s16 }
  0x1c   :  { %p166_p0 = por %p165_p13, %p164_p12 }
  0x1e   :  { %p167_p1 = pnand %p166_p0, %p160_p11 }
  0x20   :  { %170 = shalt.err (!%p167_p1)
}
  0x21   :  { %36 = dma.hbm_to_vmem [thread:$0]  %s249_s1, 256, %s31_s8, [#allocation6], %s176_s28, %s176_s28, %s177_s29  }
  0x22   :  { %171 = dma.done.wait [#allocation4], 256  }
  0x23   :  { %172 = vsyncadd [#allocation4], 4294967040 }
  0x24   :  { %173 = dma.done.wait [#allocation6], 256  }
  0x25   :  { %174 = vsyncadd [#allocation6], 4294967040  ;;  %v51_v0 = vld [vmem:[#allocation5] sm:$0xff]  ;;  %v112_v1 = vld [vmem:[%s251_s3] ss:$0 sm:$0xff]  ;;  %vm63_vm0 = vcmask 261120   ;;  %v87_v15 = vstv %s252_s4 }
  0x26   :  { %v49_v2 = vld [vmem:[#allocation3] sm:$0xff]  ;;  %v76_v3 = vmul.f32 %v112_v1, %v51_v0  ;;  %v52_v5 = vld [vmem:[#allocation5 + $0x8] sm:$0xff]  ;;  %v50_v6 = vld [vmem:[#allocation3 + $0x8] sm:$0xff]  ;;  %vm102_vm1 = vcmask 7168  }
  0x27   :  { %v111_v4 = vld [vmem:[%s250_s2] ss:$0 sm:$0xff]  ;;  %v77_v8 = vmul.f32 %v112_v1, %v52_v5 }
  0x28   :  { %v61_v7 = vmul.f32 %v111_v4, %v49_v2  ;;  %v62_v9 = vmul.f32 %v111_v4, %v50_v6  ;;  %v78_v10 = vsel %vm63_vm0, %v76_v3, 0.0 }
  0x29   :  { %79 = vadd.xlane.f32.xlu1 %v78_v10  ;;  %v81_v12 = vsel %vm63_vm0, %v77_v8, 0.0 }
  0x2a   :  { %v64_v11 = vsel %vm63_vm0, %v61_v7, 0.0  ;;  %v67_v13 = vsel %vm63_vm0, %v62_v9, 0.0 }
  0x2b   :  { %65 = vadd.xlane.f32.xlu0 %v64_v11 }
  0x2d   :  { %82 = vadd.xlane.f32.xlu1 %v81_v12 }
  0x2f   :  { %68 = vadd.xlane.f32.xlu0 %v67_v13 }
  0xb6   :  { %v80_v14 = vpop.xlane.xlu1 %79 }
  0xb8   :  { %v66_v16 = vpop.xlane.xlu0 %65 }
  0xb9   :  { %v84_v17 = vadd.f32 %v80_v14, %v66_v16 }
  0xba   :  { %v83_v19 = vpop.xlane.xlu1 %82 }
  0xbb   :  { %v88_v18 = vadd.f32 %v87_v15, %v84_v17 }
  0xbc   :  { %v69_v20 = vpop.xlane.xlu0 %68 }
  0xbd   :  { %v113_v21 = vmul.f32 -1.442695, %v88_v18  ;;  %v85_v22 = vadd.f32 %v83_v19, %v69_v20 }
  0xbf   :  { %119 = vpow2.f32 %v113_v21  ;;  %v89_v23 = vadd.f32 %v87_v15, %v85_v22 }
  0xc1   :  { %v114_v24 = vmul.f32 -1.442695, %v89_v23 }
  0xc3   :  { %121 = vpow2.f32 %v114_v24 }
  0xc9   :  { %v120_v25 = vpop.eup %119 }
  0xca   :  { %v96_v26 = vadd.f32 1.0, %v120_v25 }
  0xcc   :  { %123 = vrcp.f32 %v96_v26 }
  0xcd   :  { %v122_v27 = vpop.eup %121 }
  0xce   :  { %v97_v28 = vadd.f32 1.0, %v122_v27 }
  0xd0   :  { %125 = vrcp.f32 %v97_v28 }
  0xd6   :  { %v124_v29 = vpop.eup %123 }
  0xd7   :  { %103 = vst.msk [vmem:[%s253_s5] sm:$0xff] %vm102_vm1, %v124_v29 }
  0xda   :  { %v126_v30 = vpop.eup %125 }
  0xdb   :  { %104 = vst.msk [vmem:[%s253_s5 + $0x8] sm:$0xff] %vm102_vm1, %v126_v30 }
  0xdc   :  { %109 = vsyncpa [#allocation4], 1 }
  0xdd   :  { %110 = vsyncpa [#allocation6], 1 }

</bundles_post_ra>
